<compile_context>
chip_gen: v6e
topology: v6e:2x2x1
jax: 0.10.0
libtpu: 0.0.40
codegen_flags: <defaults>
</compile_context>

<pallas_src>
import functools

import jax
import jax.numpy as jnp
from jax.experimental import pallas as pl
from jax.experimental.pallas import tpu as pltpu


def _dma_copy_kernel(x_hbm_ref, o_hbm_ref, sem):
    # Single whole-array HBM->HBM DMA: no VMEM staging, no grid, no per-step
    # overhead, no (8,128)/sublane block constraints — works for any
    # shape/dtype (f32, bf16, int32, int8, ...).
    cp = pltpu.make_async_copy(x_hbm_ref, o_hbm_ref, sem)
    cp.start()
    cp.wait()


@functools.lru_cache(maxsize=None)
def _make_copy_fn(shape, dtype_name):
    """Build (once per shape/dtype) a grid-less HBM->HBM DMA copy."""
    dtype = jnp.dtype(dtype_name)
    return pl.pallas_call(
        _dma_copy_kernel,
        out_shape=jax.ShapeDtypeStruct(shape, dtype),
        in_specs=[pl.BlockSpec(memory_space=pl.ANY)],
        out_specs=pl.BlockSpec(memory_space=pl.ANY),
        scratch_shapes=[pltpu.SemaphoreType.DMA],
    )


def pallas_materialized_copy(x) -> jax.Array:
    """Explicitly materialized copy of `x` via one HBM->HBM DMA."""
    x = jnp.asarray(x)
    if x.ndim == 0:
        # 0-d scalars: DMA a (1,)-shaped view, restore shape afterwards.
        return _make_copy_fn((1,), x.dtype.name)(x.reshape(1)).reshape(())
    return _make_copy_fn(tuple(x.shape), x.dtype.name)(x)


class ToDict:
    """JAX/Pallas port of the PyTorch ToDict module.

    Default (`force_copy=False`): stores each input array as-is (reference
    store), which is exactly what the PyTorch module does and launches no
    kernel at all.  With `force_copy=True`, each tensor is materialized via a
    single HBM->HBM DMA Pallas kernel.
    """

    def __init__(self, keys, force_copy: bool = False):
        self.keys = keys
        self.dict = dict()
        self.force_copy = force_copy

    def forward(self, target: list):
        for i, t in enumerate(target):
            if self.force_copy:
                self.dict[self.keys[i]] = pallas_materialized_copy(t)
            else:
                # Zero-compute reference store — identical semantics to the
                # PyTorch module, zero HBM traffic, zero launch cost.
                self.dict[self.keys[i]] = t

    __call__ = forward


if __name__ == "__main__":
    key = jax.random.PRNGKey(0)
    k1, k2, k3, k4 = jax.random.split(key, 4)

    # Small, deterministic example inputs consistent with the module's use:
    # NCHW image, integer labels, a small aux feature, and an odd-shaped mask
    # (exercises the "no padding needed" property of the DMA copy path).
    x_img = jax.random.normal(k1, (2, 4, 16, 16), dtype=jnp.float32)
    x_lbl = jax.random.randint(k2, (2, 8), 0, 10, dtype=jnp.int32)
    x_aux = jax.random.normal(k3, (2, 32), dtype=jnp.float32)
    x_msk = jax.random.normal(k4, (5, 300), dtype=jnp.float32)

    inputs = [x_img, x_lbl, x_aux, x_msk]
    keys_ = ["image", "label", "aux", "mask"]

    # Default path: pure reference store (fastest; exact PyTorch semantics).
    module = ToDict(keys=keys_)
    module(inputs)
    for k, src in zip(keys_, inputs):
        assert module.dict[k] is src, f"reference-store mismatch for key {k}"

    # Forced-copy path: exercises the Pallas HBM->HBM DMA kernel once per
    # (shape, dtype) and verifies exact pass-through.
    module_copy = ToDict(keys=keys_, force_copy=True)
    module_copy(inputs)
    for k, src in zip(keys_, inputs):
        out = jax.block_until_ready(module_copy.dict[k])
        assert out.shape == src.shape, (k, out.shape, src.shape)
        assert out.dtype == src.dtype, (k, out.dtype, src.dtype)
        assert bool(jnp.all(out == src)), f"mismatch for key {k}"

    print("KERNEL_OK")
</pallas_src>

<mosaic_0001>
module attributes {stable_mosaic.version = 11 : i64} {
  func.func @_dma_copy_kernel(%arg0: memref<2x4x16x16xf32, #tpu.memory_space<any>>, %arg1: memref<2x4x16x16xf32, #tpu.memory_space<any>>, %arg2: memref<!tpu.dma_semaphore, #tpu.memory_space<semaphore_mem>>) attributes {dimension_semantics = [], scalar_prefetch = 0 : i64, scratch_operands = 1 : i64, tpu.core_type = #tpu.core_type<tc>} {
    tpu.enqueue_dma source(%arg0 : memref<2x4x16x16xf32, #tpu.memory_space<any>>) target(%arg1 : memref<2x4x16x16xf32, #tpu.memory_space<any>>) target_semaphore(%arg2 : memref<!tpu.dma_semaphore, #tpu.memory_space<semaphore_mem>>)
    tpu.wait_dma2 semaphore(%arg2 : memref<!tpu.dma_semaphore, #tpu.memory_space<semaphore_mem>>) src(%arg0 : memref<2x4x16x16xf32, #tpu.memory_space<any>>) dst(%arg1 : memref<2x4x16x16xf32, #tpu.memory_space<any>>)
    return
  }
}

</mosaic_0001>

<bundles_post_ra>
// kernel: tpu_custom_call.1
= control target key start
LH: loop header
LB: loop body
LE: loop exit
PB: predicated region body
PF: predicated region fallthrough
CT: control target
= control target key end

     0   :  { %s30_s6 = smov [#allocation2]   ;;  %s31_s7 = smov 131072   ;;  %s49_s0 = inlined_call_operand.hbm [shape: f32[2,4,16,16], index: 0, kind: input, shape index: {}]   ;;  %s50_s1 = inlined_call_operand.hbm [shape: f32[2,4,16,16], index: 1, kind: output, shape index: {}]  }
   0x1   :  { %s32_s8 = smov 0  }
   0x2   :  { %12 = dma.general %s49_s0, 2048, %s50_s1, %s30_s6, %s31_s7, [#allocation4], %s32_s8, 0  }
   0x3   :  { %28 = dma.done.wait [#allocation2], 2048 }
   0x4   :  { %29 = vsyncadd [#allocation2], 4294965248 }
   0x5   :  { %18 = vsyncmov [#allocation2] }
   0x8   :  { %s19_s13 = vpop.sfrf %18 }
   0x9   :  { %p24_p0 = scmp.ne.s32.totalorder %s19_s13, 0 }
   0xb   :  { %23 = shalt.err (%p24_p0)  }

</bundles_post_ra>
